<compile_context>
chip_gen: v6e
topology: v6e:2x2x1
jax: 0.10.0
libtpu: 0.0.40
codegen_flags: <defaults>
</compile_context>

<pallas_src>
import jax
import jax.numpy as jnp
from jax.experimental import pallas as pl
from jax.experimental.pallas import tpu as pltpu

LANE = 128      # vreg lane width
SUBLANE = 8     # f32 sublane count


def _round_up(n, m):
    return ((n + m - 1) // m) * m


def _leaky_relu(x, negative_slope=0.01):
    return jnp.where(x >= 0, x, negative_slope * x)


def env_model_kernel(x_ref,
                     w1_ref, b1_ref,
                     w2_ref, b2_ref,
                     w3_ref, b3_ref,
                     wh_ref, bh_ref,
                     out_ref):
    cdt = x_ref.dtype   # compute dtype for MXU inputs (f32 or bf16)

    # input_layer1 + leaky_relu
    h = jnp.dot(x_ref[...], w1_ref[...], preferred_element_type=jnp.float32)
    h = _leaky_relu(h + b1_ref[...]).astype(cdt)

    # hidden_layer1 + leaky_relu
    h = jnp.dot(h, w2_ref[...], preferred_element_type=jnp.float32)
    h = _leaky_relu(h + b2_ref[...]).astype(cdt)

    # hidden_layer2 + leaky_relu
    h = jnp.dot(h, w3_ref[...], preferred_element_type=jnp.float32)
    h = _leaky_relu(h + b3_ref[...]).astype(cdt)

    # fused output heads (next_state | reward), single lane-dense store
    out = jnp.dot(h, wh_ref[...], preferred_element_type=jnp.float32) + bh_ref[...]
    out_ref[...] = out.astype(out_ref.dtype)


def environment_model_forward(x, params, *, tb=256, compute_dtype=jnp.float32):
    """x: [B, input_dims + n_actions] float32.  params: dict of weights/biases.

    Returns (pred_next_state [B, input_dims], pred_reward [B, 1]) in float32.
    """
    B, in_feat = x.shape
    input_dims = params["wns"].shape[1]
    h_size = params["w1"].shape[1]

    # padded (lane-dense) dimensions
    in_pad = _round_up(in_feat, LANE)
    h_pad = _round_up(h_size, LANE)
    out_pad = _round_up(input_dims + 1, LANE)

    # batch tiling: TB multiple of 8, capped at `tb`; pad B up to a multiple of TB
    TB = _round_up(min(tb, _round_up(B, SUBLANE)), SUBLANE)
    B_pad = _round_up(B, TB)
    nb = B_pad // TB

    def pad2(a, rows, cols):
        return jnp.pad(a, ((0, rows - a.shape[0]), (0, cols - a.shape[1])))

    # fuse the two output heads into one [h, input_dims + 1] matmul
    w_head = jnp.concatenate([params["wns"], params["wr"]], axis=1)
    b_head = jnp.concatenate([params["bns"], params["br"]], axis=1)

    xp = pad2(x, B_pad, in_pad).astype(compute_dtype)
    w1 = pad2(params["w1"], in_pad, h_pad).astype(compute_dtype)
    w2 = pad2(params["w2"], h_pad, h_pad).astype(compute_dtype)
    w3 = pad2(params["w3"], h_pad, h_pad).astype(compute_dtype)
    wh = pad2(w_head, h_pad, out_pad).astype(compute_dtype)
    b1 = pad2(params["b1"], 1, h_pad)        # biases stay f32 (added to f32 acc)
    b2 = pad2(params["b2"], 1, h_pad)
    b3 = pad2(params["b3"], 1, h_pad)
    bh = pad2(b_head, 1, out_pad)

    def resident(shape):
        # weights/biases: same block every grid step -> stay VMEM-resident
        return pl.BlockSpec(shape, lambda i: (0, 0))

    out = pl.pallas_call(
        env_model_kernel,
        out_shape=jax.ShapeDtypeStruct((B_pad, out_pad), jnp.float32),
        grid=(nb,),
        in_specs=[
            pl.BlockSpec((TB, in_pad), lambda i: (i, 0)),   # x: batch-tiled
            resident((in_pad, h_pad)), resident((1, h_pad)),
            resident((h_pad, h_pad)), resident((1, h_pad)),
            resident((h_pad, h_pad)), resident((1, h_pad)),
            resident((h_pad, out_pad)), resident((1, out_pad)),
        ],
        out_specs=pl.BlockSpec((TB, out_pad), lambda i: (i, 0)),
        compiler_params=pltpu.CompilerParams(
            dimension_semantics=("parallel",),       # v7x: shard batch across 2 TCs
            vmem_limit_bytes=32 * 1024 * 1024,       # safe on v7x's 64 MiB VMEM too
        ),
    )(xp, w1, b1, w2, b2, w3, b3, wh, bh)

    pred_next_state = out[:B, :input_dims]
    pred_reward = out[:B, input_dims:input_dims + 1]
    return pred_next_state, pred_reward


def init_params(key, input_dims, n_actions, h_size):
    """Deterministic synthetic init. Weights stored as [in, out] (transposed vs torch)."""
    in_dim = input_dims + n_actions
    keys = jax.random.split(key, 10)

    def linear(kw, kb, fan_in, fan_out):
        bound = 1.0 / jnp.sqrt(fan_in)
        w = jax.random.uniform(kw, (fan_in, fan_out), jnp.float32, -bound, bound)
        b = jax.random.uniform(kb, (1, fan_out), jnp.float32, -bound, bound)
        return w, b

    w1, b1 = linear(keys[0], keys[1], in_dim, h_size)
    w2, b2 = linear(keys[2], keys[3], h_size, h_size)
    w3, b3 = linear(keys[4], keys[5], h_size, h_size)
    wns, bns = linear(keys[6], keys[7], h_size, input_dims)
    wr, br = linear(keys[8], keys[9], h_size, 1)
    return dict(w1=w1, b1=b1, w2=w2, b2=b2, w3=w3, b3=b3,
                wns=wns, bns=bns, wr=wr, br=br)


def _reference_forward(x, p):
    h = jax.nn.leaky_relu(x @ p["w1"] + p["b1"], 0.01)
    h = jax.nn.leaky_relu(h @ p["w2"] + p["b2"], 0.01)
    h = jax.nn.leaky_relu(h @ p["w3"] + p["b3"], 0.01)
    return h @ p["wns"] + p["bns"], h @ p["wr"] + p["br"]


if __name__ == "__main__":
    input_dims, n_actions, h_size, batch = 16, 4, 32, 8

    key = jax.random.PRNGKey(0)
    k_params, k_x = jax.random.split(key)

    params = init_params(k_params, input_dims, n_actions, h_size)
    x = jax.random.normal(k_x, (batch, input_dims + n_actions), jnp.float32)

    pred_next_state, pred_reward = environment_model_forward(x, params)
    jax.block_until_ready((pred_next_state, pred_reward))

    # sanity check against plain-JAX reference (exact f32 path)
    ref_ns, ref_r = _reference_forward(x, params)
    assert pred_next_state.shape == (batch, input_dims)
    assert pred_reward.shape == (batch, 1)
    assert jnp.allclose(pred_next_state, ref_ns, atol=1e-5, rtol=1e-5)
    assert jnp.allclose(pred_reward, ref_r, atol=1e-5, rtol=1e-5)

    print("KERNEL_OK")
</pallas_src>

<mosaic_0001>
module attributes {stable_mosaic.version = 11 : i64} {
  func.func @env_model_kernel(%arg0: i32, %arg1: memref<8x128xf32, #tpu.memory_space<vmem>>, %arg2: memref<128x128xf32, #tpu.memory_space<vmem>>, %arg3: memref<1x128xf32, #tpu.memory_space<vmem>>, %arg4: memref<128x128xf32, #tpu.memory_space<vmem>>, %arg5: memref<1x128xf32, #tpu.memory_space<vmem>>, %arg6: memref<128x128xf32, #tpu.memory_space<vmem>>, %arg7: memref<1x128xf32, #tpu.memory_space<vmem>>, %arg8: memref<128x128xf32, #tpu.memory_space<vmem>>, %arg9: memref<1x128xf32, #tpu.memory_space<vmem>>, %arg10: memref<8x128xf32, #tpu.memory_space<vmem>>) attributes {dimension_semantics = [#tpu.dimension_semantics<parallel>], iteration_bounds = array<i64: 1>, scalar_prefetch = 0 : i64, scratch_operands = 0 : i64, tpu.core_type = #tpu.core_type<tc>, window_params = [{transform_indices = @transform_0, window_bounds = array<i64: 8, 128>}, {pipeline_mode = #tpu.pipeline_mode<synchronous>, transform_indices = @transform_1, window_bounds = array<i64: 128, 128>}, {pipeline_mode = #tpu.pipeline_mode<synchronous>, transform_indices = @transform_2, window_bounds = array<i64: 1, 128>}, {pipeline_mode = #tpu.pipeline_mode<synchronous>, transform_indices = @transform_3, window_bounds = array<i64: 128, 128>}, {pipeline_mode = #tpu.pipeline_mode<synchronous>, transform_indices = @transform_4, window_bounds = array<i64: 1, 128>}, {pipeline_mode = #tpu.pipeline_mode<synchronous>, transform_indices = @transform_5, window_bounds = array<i64: 128, 128>}, {pipeline_mode = #tpu.pipeline_mode<synchronous>, transform_indices = @transform_6, window_bounds = array<i64: 1, 128>}, {pipeline_mode = #tpu.pipeline_mode<synchronous>, transform_indices = @transform_7, window_bounds = array<i64: 128, 128>}, {pipeline_mode = #tpu.pipeline_mode<synchronous>, transform_indices = @transform_8, window_bounds = array<i64: 1, 128>}, {transform_indices = @transform_9, window_bounds = array<i64: 8, 128>}]} {
    %c0 = arith.constant 0 : index
    %c0_0 = arith.constant 0 : index
    %0 = vector.load %arg1[%c0, %c0_0] : memref<8x128xf32, #tpu.memory_space<vmem>>, vector<8x128xf32>
    %c0_1 = arith.constant 0 : index
    %c0_2 = arith.constant 0 : index
    %1 = vector.load %arg2[%c0_1, %c0_2] : memref<128x128xf32, #tpu.memory_space<vmem>>, vector<128x128xf32>
    %cst = arith.constant dense<0.000000e+00> : vector<8x128xf32>
    %2 = tpu.matmul %0, %1, %cst {dimension_numbers = #tpu.dot_dimension_numbers<[1], [0], [0], [1], [0, 0, 1, 1], [], []>} : vector<8x128xf32>, vector<128x128xf32>, vector<8x128xf32> -> vector<8x128xf32>
    %c0_3 = arith.constant 0 : index
    %c0_4 = arith.constant 0 : index
    %3 = vector.load %arg3[%c0_3, %c0_4] : memref<1x128xf32, #tpu.memory_space<vmem>>, vector<1x128xf32>
    %4 = vector.broadcast %3 : vector<1x128xf32> to vector<8x128xf32>
    %5 = arith.addf %2, %4 : vector<8x128xf32>
    %cst_5 = arith.constant 0.000000e+00 : f32
    %6 = vector.broadcast %cst_5 : f32 to vector<8x128xf32>
    %7 = arith.cmpf oge, %5, %6 : vector<8x128xf32>
    %cst_6 = arith.constant 0.00999999977 : f32
    %8 = vector.broadcast %cst_6 : f32 to vector<8x128xf32>
    %9 = arith.mulf %8, %5 : vector<8x128xf32>
    %10 = arith.select %7, %5, %9 : vector<8x128xi1>, vector<8x128xf32>
    %c0_7 = arith.constant 0 : index
    %c0_8 = arith.constant 0 : index
    %11 = vector.load %arg4[%c0_7, %c0_8] : memref<128x128xf32, #tpu.memory_space<vmem>>, vector<128x128xf32>
    %cst_9 = arith.constant dense<0.000000e+00> : vector<8x128xf32>
    %12 = tpu.matmul %10, %11, %cst_9 {dimension_numbers = #tpu.dot_dimension_numbers<[1], [0], [0], [1], [0, 0, 1, 1], [], []>} : vector<8x128xf32>, vector<128x128xf32>, vector<8x128xf32> -> vector<8x128xf32>
    %c0_10 = arith.constant 0 : index
    %c0_11 = arith.constant 0 : index
    %13 = vector.load %arg5[%c0_10, %c0_11] : memref<1x128xf32, #tpu.memory_space<vmem>>, vector<1x128xf32>
    %14 = vector.broadcast %13 : vector<1x128xf32> to vector<8x128xf32>
    %15 = arith.addf %12, %14 : vector<8x128xf32>
    %cst_12 = arith.constant 0.000000e+00 : f32
    %16 = vector.broadcast %cst_12 : f32 to vector<8x128xf32>
    %17 = arith.cmpf oge, %15, %16 : vector<8x128xf32>
    %cst_13 = arith.constant 0.00999999977 : f32
    %18 = vector.broadcast %cst_13 : f32 to vector<8x128xf32>
    %19 = arith.mulf %18, %15 : vector<8x128xf32>
    %20 = arith.select %17, %15, %19 : vector<8x128xi1>, vector<8x128xf32>
    %c0_14 = arith.constant 0 : index
    %c0_15 = arith.constant 0 : index
    %21 = vector.load %arg6[%c0_14, %c0_15] : memref<128x128xf32, #tpu.memory_space<vmem>>, vector<128x128xf32>
    %cst_16 = arith.constant dense<0.000000e+00> : vector<8x128xf32>
    %22 = tpu.matmul %20, %21, %cst_16 {dimension_numbers = #tpu.dot_dimension_numbers<[1], [0], [0], [1], [0, 0, 1, 1], [], []>} : vector<8x128xf32>, vector<128x128xf32>, vector<8x128xf32> -> vector<8x128xf32>
    %c0_17 = arith.constant 0 : index
    %c0_18 = arith.constant 0 : index
    %23 = vector.load %arg7[%c0_17, %c0_18] : memref<1x128xf32, #tpu.memory_space<vmem>>, vector<1x128xf32>
    %24 = vector.broadcast %23 : vector<1x128xf32> to vector<8x128xf32>
    %25 = arith.addf %22, %24 : vector<8x128xf32>
    %cst_19 = arith.constant 0.000000e+00 : f32
    %26 = vector.broadcast %cst_19 : f32 to vector<8x128xf32>
    %27 = arith.cmpf oge, %25, %26 : vector<8x128xf32>
    %cst_20 = arith.constant 0.00999999977 : f32
    %28 = vector.broadcast %cst_20 : f32 to vector<8x128xf32>
    %29 = arith.mulf %28, %25 : vector<8x128xf32>
    %30 = arith.select %27, %25, %29 : vector<8x128xi1>, vector<8x128xf32>
    %c0_21 = arith.constant 0 : index
    %c0_22 = arith.constant 0 : index
    %31 = vector.load %arg8[%c0_21, %c0_22] : memref<128x128xf32, #tpu.memory_space<vmem>>, vector<128x128xf32>
    %cst_23 = arith.constant dense<0.000000e+00> : vector<8x128xf32>
    %32 = tpu.matmul %30, %31, %cst_23 {dimension_numbers = #tpu.dot_dimension_numbers<[1], [0], [0], [1], [0, 0, 1, 1], [], []>} : vector<8x128xf32>, vector<128x128xf32>, vector<8x128xf32> -> vector<8x128xf32>
    %c0_24 = arith.constant 0 : index
    %c0_25 = arith.constant 0 : index
    %33 = vector.load %arg9[%c0_24, %c0_25] : memref<1x128xf32, #tpu.memory_space<vmem>>, vector<1x128xf32>
    %34 = vector.broadcast %33 : vector<1x128xf32> to vector<8x128xf32>
    %35 = arith.addf %32, %34 : vector<8x128xf32>
    %c0_26 = arith.constant 0 : index
    %c0_27 = arith.constant 0 : index
    %36 = vector.load %arg10[%c0_26, %c0_27] : memref<8x128xf32, #tpu.memory_space<vmem>>, vector<8x128xf32>
    tpu.vector_store %arg10[%c0_26, %c0_27], %35 {strides = array<i32>} : memref<8x128xf32, #tpu.memory_space<vmem>>, vector<8x128xf32>,
    return
  }
  func.func @transform_0(%arg0: i32) -> (i32, i32) {
    %c0_i32 = arith.constant 0 : i32
    %c0_i32_0 = arith.constant 0 : i32
    return %arg0, %c0_i32 : i32, i32
  }
  func.func @transform_1(%arg0: i32) -> (i32, i32) {
    %c0_i32 = arith.constant 0 : i32
    %c0_i32_0 = arith.constant 0 : i32
    %c0_i32_1 = arith.constant 0 : i32
    return %c0_i32, %c0_i32_0 : i32, i32
  }
  func.func @transform_2(%arg0: i32) -> (i32, i32) {
    %c0_i32 = arith.constant 0 : i32
    %c0_i32_0 = arith.constant 0 : i32
    %c0_i32_1 = arith.constant 0 : i32
    return %c0_i32, %c0_i32_0 : i32, i32
  }
  func.func @transform_3(%arg0: i32) -> (i32, i32) {
    %c0_i32 = arith.constant 0 : i32
    %c0_i32_0 = arith.constant 0 : i32
    %c0_i32_1 = arith.constant 0 : i32
    return %c0_i32, %c0_i32_0 : i32, i32
  }
  func.func @transform_4(%arg0: i32) -> (i32, i32) {
    %c0_i32 = arith.constant 0 : i32
    %c0_i32_0 = arith.constant 0 : i32
    %c0_i32_1 = arith.constant 0 : i32
    return %c0_i32, %c0_i32_0 : i32, i32
  }
  func.func @transform_5(%arg0: i32) -> (i32, i32) {
    %c0_i32 = arith.constant 0 : i32
    %c0_i32_0 = arith.constant 0 : i32
    %c0_i32_1 = arith.constant 0 : i32
    return %c0_i32, %c0_i32_0 : i32, i32
  }
  func.func @transform_6(%arg0: i32) -> (i32, i32) {
    %c0_i32 = arith.constant 0 : i32
    %c0_i32_0 = arith.constant 0 : i32
    %c0_i32_1 = arith.constant 0 : i32
    return %c0_i32, %c0_i32_0 : i32, i32
  }
  func.func @transform_7(%arg0: i32) -> (i32, i32) {
    %c0_i32 = arith.constant 0 : i32
    %c0_i32_0 = arith.constant 0 : i32
    %c0_i32_1 = arith.constant 0 : i32
    return %c0_i32, %c0_i32_0 : i32, i32
  }
  func.func @transform_8(%arg0: i32) -> (i32, i32) {
    %c0_i32 = arith.constant 0 : i32
    %c0_i32_0 = arith.constant 0 : i32
    %c0_i32_1 = arith.constant 0 : i32
    return %c0_i32, %c0_i32_0 : i32, i32
  }
  func.func @transform_9(%arg0: i32) -> (i32, i32) {
    %c0_i32 = arith.constant 0 : i32
    %c0_i32_0 = arith.constant 0 : i32
    return %arg0, %c0_i32 : i32, i32
  }
}

</mosaic_0001>

<bundles_post_ra>
// kernel: tpu_custom_call.1
= control target key start
LH: loop header
LB: loop body
LE: loop exit
PB: predicated region body
PF: predicated region fallthrough
CT: control target
= control target key end

     0   :  { %14 = vsyncpa [#allocation3], 0  ;;  %s1023_s0 = inlined_call_operand.hbm [shape: f32[8,128], index: 0, kind: input, shape index: {}]   ;;  %s1024_s1 = inlined_call_operand.hbm [shape: f32[128,128], index: 1, kind: input, shape index: {}]   ;;  %s1025_s2 = inlined_call_operand.vmem [shape: f32[1,128], index: 2, kind: input, shape index: {}]   ;;  %s1026_s3 = inlined_call_operand.hbm [shape: f32[128,128], index: 3, kind: input, shape index: {}]   ;;  %s1027_s4 = inlined_call_operand.vmem [shape: f32[1,128], index: 4, kind: input, shape index: {}]   ;;  %s1028_s5 = inlined_call_operand.hbm [shape: f32[128,128], index: 5, kind: input, shape index: {}]   ;;  %s1029_s6 = inlined_call_operand.vmem [shape: f32[1,128], index: 6, kind: input, shape index: {}]   ;;  %s1030_s7 = inlined_call_operand.hbm [shape: f32[128,128], index: 7, kind: input, shape index: {}]   ;;  %s1031_s8 = inlined_call_operand.vmem [shape: f32[1,128], index: 8, kind: input, shape index: {}]   ;;  %s1032_s9 = inlined_call_operand.hbm [shape: f32[8,128], index: 9, kind: output, shape index: {}]  }
   0x1   :  { %15 = vsyncpa [#allocation6], 0 }
   0x2   :  { %16 = vsyncpa [#allocation9], 0 }
   0x3   :  { %17 = vsyncpa [#allocation4], 0  ;;  %s849_s30 = smov [#allocation5]  }
   0x4   :  { %s33_s10 = sshll.u32 %s849_s30, 4  ;;  %s34_s10 = int_to_ptr.vmem [resolvable:$true] %s33_s10 }
   0x5   :  { %s729_s11 = scalar_lea.vmem %s34_s10, 2048  ;;  %p734_p1 = scmp.lt.s32.totalorder %s34_s10, %s34_s10 }
   0x6   :  { %p730_p0 = scmp.ne.s32.totalorder %s34_s10, %s729_s11  ;;  %p735_p2 = scmp.lt.s32.totalorder %s729_s11, %s729_s11 }
   0x8   :  { %p736_p3 = por %p735_p2, %p734_p1 }
   0xa   :  { %p737_p4 = pnand %p736_p3, %p730_p0 }
   0xc   :  { %740 = shalt.err (!%p737_p4)
}
   0xd   :  { %s850_s12 = smov 128   ;;  %s851_s13 = smov 8  }
   0xe   :  { %39 = dma.hbm_to_vmem [thread:$0]  %s1024_s1, 2048, %s34_s10, [#allocation6], %s850_s12, %s850_s12, %s851_s13  }
   0xf   :  { %s852_s16 = smov [#allocation8]   ;;  %s853_s18 = smov [#allocation2]  }
  0x10   :  { %s61_s17 = sshll.u32 %s852_s16, 4  ;;  %s24_s19 = sshll.u32 %s853_s18, 4  ;;  %s62_s17 = int_to_ptr.vmem [resolvable:$true] %s61_s17  ;;  %s25_s19 = int_to_ptr.vmem [resolvable:$true] %s24_s19 }
  0x11   :  { %s749_s20 = scalar_lea.vmem %s62_s17, 2048  ;;  %p754_p6 = scmp.lt.s32.totalorder %s62_s17, %s62_s17 }
  0x12   :  { %p750_p5 = scmp.ne.s32.totalorder %s62_s17, %s749_s20  ;;  %p755_p7 = scmp.lt.s32.totalorder %s749_s20, %s749_s20 }
  0x14   :  { %p756_p8 = por %p755_p7, %p754_p6 }
  0x16   :  { %p757_p9 = pnand %p756_p8, %p750_p5 }
  0x18   :  { %760 = shalt.err (!%p757_p9)
}
  0x19   :  { %67 = dma.hbm_to_vmem [thread:$0]  %s1028_s5, 2048, %s62_s17, [#allocation9], %s850_s12, %s850_s12, %s851_s13  }
  0x1a   :  { %s769_s1 = scalar_lea.vmem %s25_s19, 128  ;;  %p774_p11 = scmp.lt.s32.totalorder %s25_s19, %s25_s19 }
  0x1b   :  { %p770_p10 = scmp.ne.s32.totalorder %s25_s19, %s769_s1  ;;  %p775_p12 = scmp.lt.s32.totalorder %s769_s1, %s769_s1 }
  0x1d   :  { %p776_p13 = por %p775_p12, %p774_p11 }
  0x1f   :  { %p777_p0 = pnand %p776_p13, %p770_p10 }
  0x21   :  { %780 = shalt.err (!%p777_p0)
}
  0x22   :  { %27 = dma.hbm_to_vmem [thread:$0]  %s1023_s0, 128, %s25_s19, [#allocation3]  }
  0x23   :  { %s854_s25 = smov [#allocation7]   ;;  %s855_s27 = smov [#allocation10]  }
  0x24   :  { %s47_s26 = sshll.u32 %s854_s25, 4  ;;  %s75_s28 = sshll.u32 %s855_s27, 4  ;;  %s48_s26 = int_to_ptr.vmem [resolvable:$true] %s47_s26  ;;  %s76_s28 = int_to_ptr.vmem [resolvable:$true] %s75_s28 }
  0x25   :  { %s789_s29 = scalar_lea.vmem %s48_s26, 2048  ;;  %p794_p2 = scmp.lt.s32.totalorder %s48_s26, %s48_s26 }
  0x26   :  { %p790_p1 = scmp.ne.s32.totalorder %s48_s26, %s789_s29  ;;  %p795_p3 = scmp.lt.s32.totalorder %s789_s29, %s789_s29 }
  0x28   :  { %p796_p4 = por %p795_p3, %p794_p2 }
  0x2a   :  { %p797_p5 = pnand %p796_p4, %p790_p1 }
  0x2c   :  { %800 = shalt.err (!%p797_p5)
}
  0x2d   :  { %53 = dma.hbm_to_vmem [thread:$0]  %s1026_s3, 2048, %s48_s26, [#allocation6], %s850_s12, %s850_s12, %s851_s13  }
  0x2e   :  { %s809_s0 = scalar_lea.vmem %s76_s28, 2048  ;;  %p814_p7 = scmp.lt.s32.totalorder %s76_s28, %s76_s28 }
  0x2f   :  { %p810_p6 = scmp.ne.s32.totalorder %s76_s28, %s809_s0  ;;  %p815_p8 = scmp.lt.s32.totalorder %s809_s0, %s809_s0 }
  0x31   :  { %p816_p9 = por %p815_p8, %p814_p7 }
  0x33   :  { %p817_p10 = pnand %p816_p9, %p810_p6 }
  0x35   :  { %820 = shalt.err (!%p817_p10)
}
  0x36   :  { %81 = dma.hbm_to_vmem [thread:$0]  %s1030_s7, 2048, %s76_s28, [#allocation9], %s850_s12, %s850_s12, %s851_s13  }
  0x37   :  { %841 = dma.done.wait [#allocation3], 128  }
  0x38   :  { %842 = vsyncadd [#allocation3], 4294967168 }
  0x39   :  { %843 = dma.done.wait [#allocation6], 4096  }
  0x3a   :  { %844 = vsyncadd [#allocation6], 4294963200 }
  0x3b   :  { %845 = dma.done.wait [#allocation9], 4096  }
  0x3c   :  { %846 = vsyncadd [#allocation9], 4294963200  ;;  %v856_v0 = vmov 0.0   ;;  %vm857_vm0 = vmmov 0   ;;  %v115_v1 = vld [vmem:[#allocation5 + $0x78] sm:$0xff]  ;;  %v114_v2 = vld [vmem:[#allocation5 + $0x70] sm:$0xff] }
  0x3d   :  { %571 = vmatprep.subr.mxu0 %v856_v0  ;;  %603 = vmatprep.mubr.msk.f32.mxu0 %vm857_vm0, %v856_v0  ;;  %v113_v3 = vld [vmem:[#allocation5 + $0x68] sm:$0xff]  ;;  %v112_v4 = vld [vmem:[#allocation5 + $0x60] sm:$0xff]  ;;  %v211_v5 = vld [vmem:[#allocation7 + $0x78] sm:$0xff]  ;;  %s858_s16 = smov [#allocation11]  }
  0x3e   :  { %606 = vmatprep.subr.mxu1 %v856_v0  ;;  %638 = vmatprep.mubr.msk.f32.mxu1 %vm857_vm0, %v856_v0  ;;  %v111_v6 = vld [vmem:[#allocation5 + $0x58] sm:$0xff]  ;;  %v210_v7 = vld [vmem:[#allocation7 + $0x70] sm:$0xff]  ;;  %v209_v8 = vld [vmem:[#allocation7 + $0x68] sm:$0xff]  ;;  %s488_s17 = sshll.u32 %s858_s16, 4  ;;  %s489_s17 = int_to_ptr.vmem [resolvable:$true] %s488_s17 }
  0x3f   :  { %572 = vmatpush3.msra.mxu0 %v115_v1  ;;  %607 = vmatpush3.msra.mxu1 %v211_v5  ;;  %v110_v9 = vld [vmem:[#allocation5 + $0x50] sm:$0xff]  ;;  %v208_v10 = vld [vmem:[#allocation7 + $0x60] sm:$0xff]  ;;  %v109_v11 = vld [vmem:[#allocation5 + $0x48] sm:$0xff]  ;;  %s821_s18 = scalar_lea.vmem %s489_s17, 128  ;;  %p826_p12 = scmp.lt.s32.totalorder %s489_s17, %s489_s17 }
  0x40   :  { %573 = vmatprep.subr.mxu0 %v856_v0  ;;  %608 = vmatprep.subr.mxu1 %v856_v0  ;;  %v207_v12 = vld [vmem:[#allocation7 + $0x58] sm:$0xff]  ;;  %v108_v13 = vld [vmem:[#allocation5 + $0x40] sm:$0xff]  ;;  %v206_v14 = vld [vmem:[#allocation7 + $0x50] sm:$0xff]  ;;  %p822_p11 = scmp.ne.s32.totalorder %s489_s17, %s821_s18  ;;  %p827_p13 = scmp.lt.s32.totalorder %s821_s18, %s821_s18 }
  0x41   :  { %574 = vmatpush3.msra.mxu0 %v114_v2  ;;  %609 = vmatpush3.msra.mxu1 %v210_v7  ;;  %v107_v15 = vld [vmem:[#allocation5 + $0x38] sm:$0xff]  ;;  %v205_v16 = vld [vmem:[#allocation7 + $0x48] sm:$0xff]  ;;  %v106_v17 = vld [vmem:[#allocation5 + $0x30] sm:$0xff] }
  0x42   :  { %575 = vmatprep.subr.mxu0 %v856_v0  ;;  %610 = vmatprep.subr.mxu1 %v856_v0  ;;  %v204_v18 = vld [vmem:[#allocation7 + $0x40] sm:$0xff]  ;;  %v105_v19 = vld [vmem:[#allocation5 + $0x28] sm:$0xff]  ;;  %v203_v20 = vld [vmem:[#allocation7 + $0x38] sm:$0xff]  ;;  %p828_p0 = por %p827_p13, %p826_p12 }
  0x43   :  { %576 = vmatpush3.msra.mxu0 %v113_v3  ;;  %611 = vmatpush3.msra.mxu1 %v209_v8  ;;  %v104_v21 = vld [vmem:[#allocation5 + $0x20] sm:$0xff]  ;;  %v202_v22 = vld [vmem:[#allocation7 + $0x30] sm:$0xff]  ;;  %v103_v23 = vld [vmem:[#allocation5 + $0x18] sm:$0xff] }
  0x44   :  { %577 = vmatprep.subr.mxu0 %v856_v0  ;;  %612 = vmatprep.subr.mxu1 %v856_v0  ;;  %v201_v24 = vld [vmem:[#allocation7 + $0x28] sm:$0xff]  ;;  %v102_v25 = vld [vmem:[#allocation5 + $0x10] sm:$0xff]  ;;  %v200_v26 = vld [vmem:[#allocation7 + $0x20] sm:$0xff]  ;;  %p829_p1 = pnand %p828_p0, %p822_p11 }
  0x45   :  { %578 = vmatpush3.msra.mxu0 %v112_v4  ;;  %613 = vmatpush3.msra.mxu1 %v208_v10  ;;  %v101_v27 = vld [vmem:[#allocation5 + $0x8] sm:$0xff]  ;;  %v199_v28 = vld [vmem:[#allocation7 + $0x18] sm:$0xff]  ;;  %v100_v29 = vld [vmem:[#allocation5] sm:$0xff] }
  0x46   :  { %579 = vmatprep.subr.mxu0 %v856_v0  ;;  %614 = vmatprep.subr.mxu1 %v856_v0  ;;  %v99_v30 = vld [vmem:[#allocation2] sm:$0xff]  ;;  %v198_v31 = vld [vmem:[#allocation7 + $0x10] sm:$0xff]  ;;  %v197_v32 = vld [vmem:[#allocation7 + $0x8] sm:$0xff] }
  0x47   :  { %580 = vmatpush3.msra.mxu0 %v111_v6  ;;  %615 = vmatpush3.msra.mxu1 %v207_v12  ;;  %v196_v33 = vld [vmem:[#allocation7] sm:$0xff]  ;;  %v307_v34 = vld [vmem:[#allocation8 + $0x78] sm:$0xff]  ;;  %v306_v35 = vld [vmem:[#allocation8 + $0x70] sm:$0xff] }
  0x48   :  { %581 = vmatprep.subr.mxu0 %v856_v0  ;;  %616 = vmatprep.subr.mxu1 %v856_v0  ;;  %v305_v36 = vld [vmem:[#allocation8 + $0x68] sm:$0xff]  ;;  %v304_v37 = vld [vmem:[#allocation8 + $0x60] sm:$0xff]  ;;  %v303_v38 = vld [vmem:[#allocation8 + $0x58] sm:$0xff] }
  0x49   :  { %582 = vmatpush3.msra.mxu0 %v110_v9  ;;  %617 = vmatpush3.msra.mxu1 %v206_v14  ;;  %v302_v39 = vld [vmem:[#allocation8 + $0x50] sm:$0xff]  ;;  %v301_v40 = vld [vmem:[#allocation8 + $0x48] sm:$0xff]  ;;  %v300_v41 = vld [vmem:[#allocation8 + $0x40] sm:$0xff] }
  0x4a   :  { %583 = vmatprep.subr.mxu0 %v856_v0  ;;  %618 = vmatprep.subr.mxu1 %v856_v0  ;;  %v299_v42 = vld [vmem:[#allocation8 + $0x38] sm:$0xff]  ;;  %v298_v43 = vld [vmem:[#allocation8 + $0x30] sm:$0xff]  ;;  %v297_v44 = vld [vmem:[#allocation8 + $0x28] sm:$0xff] }
  0x4b   :  { %584 = vmatpush3.msra.mxu0 %v109_v11  ;;  %619 = vmatpush3.msra.mxu1 %v205_v16  ;;  %v296_v45 = vld [vmem:[#allocation8 + $0x20] sm:$0xff]  ;;  %v295_v46 = vld [vmem:[#allocation8 + $0x18] sm:$0xff]  ;;  %v294_v53 = vld [vmem:[#allocation8 + $0x10] sm:$0xff] }
  0x4c   :  { %585 = vmatprep.subr.mxu0 %v856_v0  ;;  %620 = vmatprep.subr.mxu1 %v856_v0  ;;  %v499_v47 = vld [vmem:[%s1025_s2] ss:$0 sm:$0xff]  ;;  %v293_v54 = vld [vmem:[#allocation8 + $0x8] sm:$0xff]  ;;  %v292_v55 = vld [vmem:[#allocation8] sm:$0xff] }
  0x4d   :  { %586 = vmatpush3.msra.mxu0 %v108_v13  ;;  %621 = vmatpush3.msra.mxu1 %v204_v18  ;;  %v403_v56 = vld [vmem:[#allocation10 + $0x78] sm:$0xff]  ;;  %v402_v57 = vld [vmem:[#allocation10 + $0x70] sm:$0xff]  ;;  %v401_v58 = vld [vmem:[#allocation10 + $0x68] sm:$0xff] }
  0x4e   :  { %587 = vmatprep.subr.mxu0 %v856_v0  ;;  %622 = vmatprep.subr.mxu1 %v856_v0  ;;  %v400_v59 = vld [vmem:[#allocation10 + $0x60] sm:$0xff]  ;;  %v399_v60 = vld [vmem:[#allocation10 + $0x58] sm:$0xff]  ;;  %v398_v61 = vld [vmem:[#allocation10 + $0x50] sm:$0xff] }
  0x4f   :  { %588 = vmatpush3.msra.mxu0 %v107_v15  ;;  %623 = vmatpush3.msra.mxu1 %v203_v20  ;;  %v397_v62 = vld [vmem:[#allocation10 + $0x48] sm:$0xff]  ;;  %v396_v63 = vld [vmem:[#allocation10 + $0x40] sm:$0xff]  ;;  %v395_v1 = vld [vmem:[#allocation10 + $0x38] sm:$0xff] }
  0x50   :  { %589 = vmatprep.subr.mxu0 %v856_v0  ;;  %624 = vmatprep.subr.mxu1 %v856_v0  ;;  %v394_v2 = vld [vmem:[#allocation10 + $0x30] sm:$0xff]  ;;  %v393_v3 = vld [vmem:[#allocation10 + $0x28] sm:$0xff]  ;;  %v392_v4 = vld [vmem:[#allocation10 + $0x20] sm:$0xff] }
  0x51   :  { %590 = vmatpush3.msra.mxu0 %v106_v17  ;;  %625 = vmatpush3.msra.mxu1 %v202_v22  ;;  %v391_v5 = vld [vmem:[#allocation10 + $0x18] sm:$0xff]  ;;  %v390_v12 = vld [vmem:[#allocation10 + $0x10] sm:$0xff]  ;;  %v389_v13 = vld [vmem:[#allocation10 + $0x8] sm:$0xff] }
  0x52   :  { %591 = vmatprep.subr.mxu0 %v856_v0  ;;  %626 = vmatprep.subr.mxu1 %v856_v0  ;;  %v500_v6 = vld [vmem:[%s1027_s4] ss:$0 sm:$0xff]  ;;  %v388_v14 = vld [vmem:[#allocation10] sm:$0xff] }
  0x53   :  { %592 = vmatpush3.msra.mxu0 %v105_v19  ;;  %627 = vmatpush3.msra.mxu1 %v201_v24  ;;  %v501_v15 = vld [vmem:[%s1029_s6] ss:$0 sm:$0xff] }
  0x54   :  { %593 = vmatprep.subr.mxu0 %v856_v0  ;;  %628 = vmatprep.subr.mxu1 %v856_v0 }
  0x55   :  { %594 = vmatpush3.msra.mxu0 %v104_v21  ;;  %629 = vmatpush3.msra.mxu1 %v200_v26  ;;  %v502_v21 = vld [vmem:[%s1031_s8] ss:$0 sm:$0xff] }
  0x56   :  { %595 = vmatprep.subr.mxu0 %v856_v0  ;;  %630 = vmatprep.subr.mxu1 %v856_v0 }
  0x57   :  { %596 = vmatpush3.msra.mxu0 %v103_v23  ;;  %631 = vmatpush3.msra.mxu1 %v199_v28 }
  0x58   :  { %597 = vmatprep.subr.mxu0 %v856_v0  ;;  %632 = vmatprep.subr.mxu1 %v856_v0 }
  0x59   :  { %598 = vmatpush3.msra.mxu0 %v102_v25  ;;  %633 = vmatpush3.msra.mxu1 %v198_v31 }
  0x5a   :  { %599 = vmatprep.subr.mxu0 %v856_v0  ;;  %634 = vmatprep.subr.mxu1 %v856_v0 }
  0x5b   :  { %600 = vmatpush3.msra.mxu0 %v101_v27  ;;  %635 = vmatpush3.msra.mxu1 %v197_v32 }
  0x5c   :  { %601 = vmatprep.subr.mxu0 %v856_v0  ;;  %636 = vmatprep.subr.mxu1 %v856_v0 }
  0x5d   :  { %602 = vmatpush3.msra.mxu0 %v100_v29  ;;  %637 = vmatpush3.msra.mxu1 %v196_v33 }
  0x5e   :  { %604 = vmatmul.mubr.f32.vlgmr.msra.gmra.mxu0 %v99_v30  ;;  %641 = vmatprep.subr.mxu0 %v856_v0 }
  0x5f   :  { %673 = vmatprep.mubr.msk.f32.mxu0 %vm857_vm0, %v856_v0  ;;  %676 = vmatprep.subr.mxu1 %v856_v0 }
  0x60   :  { %642 = vmatpush3.msra.mxu0 %v307_v34 }
  0x61   :  { %643 = vmatprep.subr.mxu0 %v856_v0 }
  0x62   :  { %644 = vmatpush3.msra.mxu0 %v306_v35 }
  0x63   :  { %645 = vmatprep.subr.mxu0 %v856_v0 }
  0x64   :  { %646 = vmatpush3.msra.mxu0 %v305_v36 }
  0x65   :  { %647 = vmatprep.subr.mxu0 %v856_v0 }
  0x66   :  { %648 = vmatpush3.msra.mxu0 %v304_v37 }
  0x67   :  { %649 = vmatprep.subr.mxu0 %v856_v0 }
  0x68   :  { %650 = vmatpush3.msra.mxu0 %v303_v38 }
  0x69   :  { %651 = vmatprep.subr.mxu0 %v856_v0 }
  0x6a   :  { %652 = vmatpush3.msra.mxu0 %v302_v39 }
  0x6b   :  { %653 = vmatprep.subr.mxu0 %v856_v0 }
  0x6c   :  { %654 = vmatpush3.msra.mxu0 %v301_v40 }
  0x6d   :  { %655 = vmatprep.subr.mxu0 %v856_v0 }
  0x6e   :  { %656 = vmatpush3.msra.mxu0 %v300_v41 }
  0x6f   :  { %657 = vmatprep.subr.mxu0 %v856_v0 }
  0x70   :  { %658 = vmatpush3.msra.mxu0 %v299_v42 }
  0x71   :  { %659 = vmatprep.subr.mxu0 %v856_v0 }
  0x72   :  { %660 = vmatpush3.msra.mxu0 %v298_v43 }
  0x73   :  { %661 = vmatprep.subr.mxu0 %v856_v0 }
  0x74   :  { %662 = vmatpush3.msra.mxu0 %v297_v44 }
  0x75   :  { %663 = vmatprep.subr.mxu0 %v856_v0 }
  0x76   :  { %664 = vmatpush3.msra.mxu0 %v296_v45 }
  0x77   :  { %665 = vmatprep.subr.mxu0 %v856_v0 }
  0x78   :  { %666 = vmatpush3.msra.mxu0 %v295_v46 }
  0x79   :  { %667 = vmatprep.subr.mxu0 %v856_v0 }
  0x7a   :  { %668 = vmatpush3.msra.mxu0 %v294_v53 }
  0x7b   :  { %669 = vmatprep.subr.mxu0 %v856_v0 }
  0x7c   :  { %670 = vmatpush3.msra.mxu0 %v293_v54 }
  0x7d   :  { %671 = vmatprep.subr.mxu0 %v856_v0 }
  0x7e   :  { %672 = vmatpush3.msra.mxu0 %v292_v55 }
 0x11e   :  { %v189_v48 = vpop.f32.mrf.mxu0 }
 0x11f   :  { %v190_v49 = vadd.f32 %v499_v47, %v189_v48 }
 0x120   :  { %v605_v50 = vpop.f32.mrf.mxu0 }
 0x121   :  { %v194_v51 = vmul.f32 0.01, %v190_v49  ;;  %vm193_vm1 = vcmp.ge.f32.partialorder %v190_v49, 0.0 }
 0x123   :  { %v195_v52 = vsel %vm193_vm1, %v190_v49, %v194_v51 }
 0x124   :  { %639 = vmatmul.mubr.f32.vlgmr.msra.gmra.mxu1 %v195_v52 }
 0x125   :  { %708 = vmatprep.mubr.msk.f32.mxu1 %vm857_vm0, %v856_v0  ;;  %677 = vmatpush3.msra.mxu1 %v403_v56 }
 0x126   :  { %678 = vmatprep.subr.mxu1 %v856_v0 }
 0x127   :  { %679 = vmatpush3.msra.mxu1 %v402_v57 }
 0x128   :  { %680 = vmatprep.subr.mxu1 %v856_v0 }
 0x129   :  { %681 = vmatpush3.msra.mxu1 %v401_v58 }
 0x12a   :  { %682 = vmatprep.subr.mxu1 %v856_v0 }
 0x12b   :  { %683 = vmatpush3.msra.mxu1 %v400_v59 }
 0x12c   :  { %684 = vmatprep.subr.mxu1 %v856_v0 }
 0x12d   :  { %685 = vmatpush3.msra.mxu1 %v399_v60 }
 0x12e   :  { %686 = vmatprep.subr.mxu1 %v856_v0 }
 0x12f   :  { %687 = vmatpush3.msra.mxu1 %v398_v61 }
 0x130   :  { %688 = vmatprep.subr.mxu1 %v856_v0 }
 0x131   :  { %689 = vmatpush3.msra.mxu1 %v397_v62 }
 0x132   :  { %690 = vmatprep.subr.mxu1 %v856_v0 }
 0x133   :  { %691 = vmatpush3.msra.mxu1 %v396_v63 }
 0x134   :  { %692 = vmatprep.subr.mxu1 %v856_v0 }
 0x135   :  { %693 = vmatpush3.msra.mxu1 %v395_v1 }
 0x136   :  { %694 = vmatprep.subr.mxu1 %v856_v0 }
 0x137   :  { %695 = vmatpush3.msra.mxu1 %v394_v2 }
 0x138   :  { %696 = vmatprep.subr.mxu1 %v856_v0 }
 0x139   :  { %697 = vmatpush3.msra.mxu1 %v393_v3 }
 0x13a   :  { %698 = vmatprep.subr.mxu1 %v856_v0 }
 0x13b   :  { %699 = vmatpush3.msra.mxu1 %v392_v4 }
 0x13c   :  { %700 = vmatprep.subr.mxu1 %v856_v0 }
 0x13d   :  { %701 = vmatpush3.msra.mxu1 %v391_v5 }
 0x13e   :  { %702 = vmatprep.subr.mxu1 %v856_v0 }
 0x13f   :  { %703 = vmatpush3.msra.mxu1 %v390_v12 }
 0x140   :  { %704 = vmatprep.subr.mxu1 %v856_v0 }
 0x141   :  { %705 = vmatpush3.msra.mxu1 %v389_v13 }
 0x142   :  { %706 = vmatprep.subr.mxu1 %v856_v0 }
 0x143   :  { %707 = vmatpush3.msra.mxu1 %v388_v14 }
 0x1e4   :  { %v285_v7 = vpop.f32.mrf.mxu1 }
 0x1e5   :  { %v286_v8 = vadd.f32 %v500_v6, %v285_v7 }
 0x1e6   :  { %v640_v9 = vpop.f32.mrf.mxu1 }
 0x1e7   :  { %vm289_vm2 = vcmp.ge.f32.partialorder %v286_v8, 0.0  ;;  %v290_v10 = vmul.f32 0.01, %v286_v8 }
 0x1e9   :  { %v291_v11 = vsel %vm289_vm2, %v286_v8, %v290_v10 }
 0x1ea   :  { %674 = vmatmul.mubr.f32.vlgmr.msra.gmra.mxu0 %v291_v11 }
 0x2aa   :  { %v381_v16 = vpop.f32.mrf.mxu0 }
 0x2ab   :  { %v382_v17 = vadd.f32 %v501_v15, %v381_v16 }
 0x2ac   :  { %v675_v18 = vpop.f32.mrf.mxu0 }
 0x2ad   :  { %vm385_vm3 = vcmp.ge.f32.partialorder %v382_v17, 0.0  ;;  %v386_v19 = vmul.f32 0.01, %v382_v17 }
 0x2af   :  { %v387_v20 = vsel %vm385_vm3, %v382_v17, %v386_v19 }
 0x2b0   :  { %709 = vmatmul.mubr.f32.vlgmr.msra.gmra.mxu1 %v387_v20 }
 0x370   :  { %v477_v22 = vpop.f32.mrf.mxu1 }
 0x371   :  { %v478_v0 = vadd.f32 %v502_v21, %v477_v22 }
 0x372   :  { %v710_v23 = vpop.f32.mrf.mxu1 }
 0x373   :  { %481 = vst [vmem:[#allocation11] sm:$0xff] %v478_v0 }
 0x374   :  { %832 = shalt.err (!%p829_p1)
}
 0x375   :  { %491 = dma.vmem_to_hbm [thread:$0]  %s489_s17, 128, %s1032_s9, [#allocation4]  }
 0x376   :  { %847 = dma.done.wait [#allocation4], 128  }
 0x377   :  { %848 = vsyncadd [#allocation4], 4294967168 }
 0x378   :  { %495 = vsyncpa [#allocation3], 1 }
 0x379   :  { %496 = vsyncpa [#allocation6], 1 }
 0x37a   :  { %497 = vsyncpa [#allocation9], 1 }
 0x37b   :  { %498 = vsyncpa [#allocation4], 1 }

</bundles_post_ra>
